<compile_context>
chip_gen: v6e
topology: v6e:2x2x1
jax: 0.10.0
libtpu: 0.0.40
codegen_flags: <defaults>
</compile_context>

<pallas_src>
import math

import jax
import jax.numpy as jnp
from jax.experimental import pallas as pl
from jax.experimental.pallas import tpu as pltpu

BN_EPS = 1e-5
_MiB = 1024 * 1024


# ---------------------------------------------------------------- hw queries

def _tpu_generation():
    try:
        kind = jax.devices()[0].device_kind.lower()
    except Exception:
        return "unknown"
    for g in ("v7", "v6", "v5"):
        if g in kind:
            return g
    return "unknown"


_TPU_GEN = _tpu_generation()


def _vmem_capacity_bytes():
    try:
        return int(pltpu.get_tpu_info().vmem_capacity_bytes)
    except Exception:
        # v7x has 64 MiB / TensorCore; v5e/v6e have 128 MiB.
        return 64 * _MiB if _TPU_GEN == "v7" else 128 * _MiB


_VMEM_CAP = _vmem_capacity_bytes()
# Scoped-VMEM request cap: leave headroom for compiler-internal scratch and the
# double-buffered output writeback.  48 MiB on v7x, 112 MiB on v5e/v6e.
_VMEM_LIMIT_CAP = max(32 * _MiB, _VMEM_CAP - 16 * _MiB)
# Fused (whole-MLP-in-VMEM) budget: ~40 MiB on v7x, ~96 MiB on v5e/v6e.
_FUSED_VMEM_BUDGET = min(_VMEM_LIMIT_CAP - 8 * _MiB, int(0.75 * _VMEM_CAP))


def _default_mxu_dtype():
    # bf16 weights halve HBM traffic and feed the native bf16 2x256 MXU on
    # v6e/v7x; keep f32 elsewhere (and wherever strict PyTorch parity matters).
    return jnp.bfloat16 if _TPU_GEN in ("v6", "v7") else jnp.float32


# ---------------------------------------------------------------- helpers

def _round_up(x, m):
    return (x + m - 1) // m * m


def _pick_tn(dout_pad):
    pref = 256 if _TPU_GEN in ("v6", "v7") else 128
    if dout_pad % pref == 0:
        return pref
    return 128


def _pick_tk(din_pad):
    if din_pad <= 512:
        return din_pad
    for tk in (512, 256, 128):
        if din_pad % tk == 0:
            return tk
    return din_pad


def _vmem_limit_bytes(required):
    return int(min(_VMEM_LIMIT_CAP, max(8 * _MiB, int(1.5 * required))))


def _nbytes(a):
    return int(a.size) * a.dtype.itemsize


def _weight_block_spec(tk, tn, n):
    index_map = lambda j, k: (k, j)
    if n <= 256:
        # Tiny batch => each grid step is dominated by step overhead + weight
        # DMA; deepen the weight-stream pipeline.
        try:
            return pl.BlockSpec((tk, tn), index_map, pipeline_mode=pl.Buffered(3))
        except Exception:
            pass
    return pl.BlockSpec((tk, tn), index_map)


def _bn_stats(y):
    # Two-pass (mean, then centered sumsq) batch statistics — closer to
    # PyTorch's result than E[y^2]-E[y]^2 and essentially free (y is VMEM-resident).
    inv_n = 1.0 / y.shape[0]
    mean = jnp.sum(y, axis=0, keepdims=True) * inv_n
    d = y - mean
    var = jnp.sum(d * d, axis=0, keepdims=True) * inv_n
    return d, var


# ---------------------------------------------------------------- fused kernel

def _make_fused_mlp_kernel(num_bn_layers):
    """Whole MLP on a VMEM-resident batch.

    refs layout: (x, [w0, gamma0, beta0, w1, gamma1, beta1, ...], w_last, b_last, out)
    Weights are pre-transposed to [Din_pad, Dout_pad]; BN-layer biases are omitted
    (exactly cancelled by the mean subtraction).
    """

    def kernel(*refs):
        x_ref = refs[0]
        o_ref = refs[-1]
        p = refs[1:-1]
        h = x_ref[...]
        k = 0
        for _ in range(num_bn_layers):
            w_ref, g_ref, be_ref = p[k], p[k + 1], p[k + 2]
            k += 3
            # MXU matmul, f32 accumulation; bf16 cast (if any) only at the
            # matmul input — all BN/ReLU epilogue math stays f32.
            y = jnp.dot(h.astype(w_ref.dtype), w_ref[...],
                        preferred_element_type=jnp.float32)
            d, var = _bn_stats(y)
            z = d * jax.lax.rsqrt(var + BN_EPS) * g_ref[...] + be_ref[...]
            h = jnp.maximum(z, 0.0)
        w_ref, b_ref = p[k], p[k + 1]
        o_ref[...] = jnp.dot(h.astype(w_ref.dtype), w_ref[...],
                             preferred_element_type=jnp.float32) + b_ref[...]

    return kernel


# ---------------------------------------------------------------- tiled (fallback) kernels
# Grid = (Dout/tn, Din/tk); K (contraction) axis last, "arbitrary"; f32
# accumulator scratch lives across the K axis. BN statistics are per-feature,
# so Dout tiling is exact (no cross-tile reduction needed).

def _linear_bn_relu_tiled_kernel(x_ref, w_ref, g_ref, b_ref, o_ref, acc_ref):
    k = pl.program_id(1)

    @pl.when(k == 0)
    def _():
        acc_ref[...] = jnp.zeros_like(acc_ref)

    acc_ref[...] += jnp.dot(x_ref[...], w_ref[...],
                            preferred_element_type=jnp.float32)

    @pl.when(k == pl.num_programs(1) - 1)
    def _():
        y = acc_ref[...]
        d, var = _bn_stats(y)
        z = d * jax.lax.rsqrt(var + BN_EPS) * g_ref[...] + b_ref[...]
        o_ref[...] = jnp.maximum(z, 0.0).astype(o_ref.dtype)


def _linear_tiled_kernel(x_ref, w_ref, b_ref, o_ref, acc_ref):
    k = pl.program_id(1)

    @pl.when(k == 0)
    def _():
        acc_ref[...] = jnp.zeros_like(acc_ref)

    acc_ref[...] += jnp.dot(x_ref[...], w_ref[...],
                            preferred_element_type=jnp.float32)

    @pl.when(k == pl.num_programs(1) - 1)
    def _():
        o_ref[...] = (acc_ref[...] + b_ref[...]).astype(o_ref.dtype)


def _tiled_call(kernel, x, wt, extras, out_dtype, transcendentals):
    n, din_p = x.shape
    dout_p = wt.shape[1]
    tn = _pick_tn(dout_p)
    tk = _pick_tk(din_p)
    grid = (dout_p // tn, din_p // tk)

    required = (2 * n * tk * x.dtype.itemsize            # x blocks (double-buffered)
                + 3 * tk * tn * wt.dtype.itemsize        # weight blocks
                + n * tn * 4                              # accumulator scratch
                + 2 * n * tn * jnp.dtype(out_dtype).itemsize
                + 4 * tn * 4)
    bytes_accessed = (_nbytes(x) * (dout_p // tn) + _nbytes(wt)
                      + sum(_nbytes(e) for e in extras)
                      + n * dout_p * jnp.dtype(out_dtype).itemsize)

    extra_specs = [pl.BlockSpec((1, tn), lambda j, k: (0, j)) for _ in extras]

    return pl.pallas_call(
        kernel,
        out_shape=jax.ShapeDtypeStruct((n, dout_p), out_dtype),
        grid=grid,
        in_specs=[pl.BlockSpec((n, tk), lambda j, k: (0, k)),
                  _weight_block_spec(tk, tn, n)] + extra_specs,
        out_specs=pl.BlockSpec((n, tn), lambda j, k: (0, j)),
        scratch_shapes=[pltpu.VMEM((n, tn), jnp.float32)],
        compiler_params=pltpu.CompilerParams(
            dimension_semantics=("parallel", "arbitrary"),
            vmem_limit_bytes=_vmem_limit_bytes(required)),
        cost_estimate=pl.CostEstimate(flops=2 * n * din_p * dout_p,
                                      transcendentals=int(transcendentals),
                                      bytes_accessed=int(bytes_accessed)),
    )(x, wt, *extras)


def _linear_bn_relu_tiled(x, wt, gamma, beta, out_dtype):
    return _tiled_call(_linear_bn_relu_tiled_kernel, x, wt, (gamma, beta),
                       out_dtype, transcendentals=wt.shape[1])


def _linear_tiled(x, wt, bias):
    return _tiled_call(_linear_tiled_kernel, x, wt, (bias,),
                       jnp.float32, transcendentals=0)


# ---------------------------------------------------------------- param pre-packing

def prepack_mlp_params(params, num_layers, mxu_dtype=None):
    """Transpose / pad-to-128 / cast every weight ONCE.

    Call this once per parameter set and reuse the result for every forward —
    the per-call weight relayout was as expensive (HBM traffic) as the kernel
    itself for this weight-bandwidth-bound MLP.
    """
    if num_layers < 1:
        raise ValueError("number of layers should be positive!")
    if mxu_dtype is None:
        mxu_dtype = _default_mxu_dtype()

    din = params["linears"][0][0].shape[1]
    output_dim = params["linears"][-1][0].shape[0]
    din_pad = _round_up(din, 128)

    bn = []  # (wt_pad, gamma_pad, beta_pad); BN-layer Linear bias dropped (cancelled by BN)
    prev_pad = din_pad
    for i in range(num_layers - 1):
        w, _b_dead = params["linears"][i]
        gamma, beta = params["bns"][i]
        dout, d_in = w.shape
        dout_pad = _round_up(dout, 128)
        wt = jnp.pad(w.T.astype(mxu_dtype),
                     ((0, prev_pad - d_in), (0, dout_pad - dout)))
        g = jnp.pad(gamma, ((0, 0), (0, dout_pad - gamma.shape[1])))
        be = jnp.pad(beta, ((0, 0), (0, dout_pad - beta.shape[1])))
        bn.append((wt, g, be))
        prev_pad = dout_pad

    w_last, b_last = params["linears"][-1]
    dout, d_in = w_last.shape
    out_pad = _round_up(dout, 128)
    wt_last = jnp.pad(w_last.T.astype(mxu_dtype),
                      ((0, prev_pad - d_in), (0, out_pad - dout)))
    b_last_pad = jnp.pad(b_last, ((0, 0), (0, out_pad - b_last.shape[1])))

    return {
        "mxu_dtype": mxu_dtype,
        "num_layers": num_layers,
        "din": din,
        "din_pad": din_pad,
        "output_dim": output_dim,
        "out_pad": out_pad,
        "bn": bn,
        "last": (wt_last, b_last_pad),
    }


# ---------------------------------------------------------------- forward (wrapper)

def mlp_forward(packed, x, force_tiled=False, return_padded=False):
    """Forward pass of the MLP with pre-packed parameters (see prepack_mlp_params)."""
    mxu_dtype = packed["mxu_dtype"]
    din, din_pad = packed["din"], packed["din_pad"]
    out_pad = packed["out_pad"]
    bn = packed["bn"]
    wt_last, b_last_pad = packed["last"]

    n = x.shape[0]
    x_pad = jnp.pad(x, ((0, 0), (0, din_pad - din))).astype(mxu_dtype)
    flat = [a for triple in bn for a in triple] + [wt_last, b_last_pad]

    # ---- cost / VMEM-live-set estimates
    mxu_bytes = jnp.dtype(mxu_dtype).itemsize
    widths = [t[0].shape[1] for t in bn] + [out_pad]
    flops, prev = 0, din_pad
    layer_work = 0
    for wdt in widths:
        flops += 2 * n * prev * wdt
        # h (f32) + bf16 cast temp of h + y/z/h_next (f32) live set for this layer
        layer_work = max(layer_work, n * (prev * (4 + mxu_bytes) + 3 * wdt * 4))
        prev = wdt
    transcendentals = sum(t[0].shape[1] for t in bn)
    in_bytes = _nbytes(x_pad) + sum(_nbytes(a) for a in flat)
    out_bytes = n * out_pad * 4
    bytes_accessed = in_bytes + out_bytes
    fused_vmem = in_bytes + out_bytes + layer_work

    if (not force_tiled) and fused_vmem <= _FUSED_VMEM_BUDGET:
        # ---- single fused kernel: whole MLP, no inter-layer HBM round trips
        kernel = _make_fused_mlp_kernel(packed["num_layers"] - 1)
        vmem_spec = pl.BlockSpec(memory_space=pltpu.MemorySpace.VMEM)
        out_padded = pl.pallas_call(
            kernel,
            out_shape=jax.ShapeDtypeStruct((n, out_pad), jnp.float32),
            in_specs=[vmem_spec] * (1 + len(flat)),
            out_specs=vmem_spec,
            compiler_params=pltpu.CompilerParams(
                vmem_limit_bytes=_vmem_limit_bytes(fused_vmem)),
            cost_estimate=pl.CostEstimate(flops=int(flops),
                                          transcendentals=int(transcendentals),
                                          bytes_accessed=int(bytes_accessed)),
        )(x_pad, *flat)
    else:
        # ---- per-layer Dout x Din tiled fallback (BN-safe; f32 acc across K)
        h = x_pad
        for (wt, g, be) in bn:
            h = _linear_bn_relu_tiled(h, wt, g, be, mxu_dtype)
        out_padded = _linear_tiled(h, wt_last, b_last_pad)

    if return_padded:
        # Lane-dense padded output; lets the consumer fold the slice away.
        return out_padded
    return out_padded[:, :packed["output_dim"]]


# ---------------------------------------------------------------- params + reference

def init_mlp_params(key, num_layers, input_dim, hidden_dim, output_dim):
    """PyTorch-style init: U(-1/sqrt(fan_in), 1/sqrt(fan_in)) for W and b."""
    if num_layers < 1:
        raise ValueError("number of layers should be positive!")
    if num_layers == 1:
        dims = [(input_dim, output_dim)]
    else:
        dims = [(input_dim, hidden_dim)]
        dims += [(hidden_dim, hidden_dim)] * (num_layers - 2)
        dims += [(hidden_dim, output_dim)]

    params = {"linears": [], "bns": []}
    for (din, dout) in dims:
        key, kw, kb = jax.random.split(key, 3)
        bound = 1.0 / math.sqrt(din)
        w = jax.random.uniform(kw, (dout, din), jnp.float32, -bound, bound)
        b = jax.random.uniform(kb, (1, dout), jnp.float32, -bound, bound)
        params["linears"].append((w, b))
    if num_layers > 1:
        for _ in range(num_layers - 1):
            params["bns"].append((jnp.ones((1, hidden_dim), jnp.float32),
                                  jnp.zeros((1, hidden_dim), jnp.float32)))
    return params


def mlp_forward_ref(params, x, num_layers):
    """Pure-JAX reference matching the PyTorch forward (train-mode BN, with biases)."""
    if num_layers == 1:
        w, b = params["linears"][0]
        return x @ w.T + b
    h = x
    for i in range(num_layers - 1):
        w, b = params["linears"][i]
        gamma, beta = params["bns"][i]
        y = h @ w.T + b
        mean = jnp.mean(y, axis=0, keepdims=True)
        var = jnp.mean((y - mean) ** 2, axis=0, keepdims=True)
        h = jnp.maximum((y - mean) / jnp.sqrt(var + BN_EPS) * gamma + beta, 0.0)
    w, b = params["linears"][-1]
    return h @ w.T + b


# ---------------------------------------------------------------- main

if __name__ == "__main__":
    # Test 1: small MLP, fused single-kernel path, explicit f32 (PyTorch parity).
    num_layers, input_dim, hidden_dim, output_dim = 3, 16, 32, 8
    batch = 8
    key = jax.random.PRNGKey(0)
    key, kx = jax.random.split(key)
    x = jax.random.normal(kx, (batch, input_dim), jnp.float32)
    params = init_mlp_params(key, num_layers, input_dim, hidden_dim, output_dim)
    ref = mlp_forward_ref(params, x, num_layers)

    packed_f32 = prepack_mlp_params(params, num_layers, mxu_dtype=jnp.float32)
    out = jax.block_until_ready(mlp_forward(packed_f32, x))
    assert out.shape == (batch, output_dim)
    assert jnp.allclose(out, ref, atol=1e-3, rtol=1e-3), "fused f32 mismatch vs reference"

    # Test 2: generation-default MXU dtype (bf16 on v6e/v7x, f32 otherwise);
    # f32 accumulation + f32 BN/ReLU epilogue either way.
    packed_auto = prepack_mlp_params(params, num_layers)
    out_auto = jax.block_until_ready(mlp_forward(packed_auto, x))
    assert jnp.allclose(out_auto, ref, atol=1.5e-1, rtol=1.5e-1), "auto-dtype path mismatch"

    # Test 3: Dout x Din tiled fallback (grid > 1 on both axes, K-accumulator).
    nl2, in2, hid2, out2, n2 = 3, 40, 640, 300, 32
    key, kx2 = jax.random.split(key)
    x2 = jax.random.normal(kx2, (n2, in2), jnp.float32)
    params2 = init_mlp_params(key, nl2, in2, hid2, out2)
    packed2 = prepack_mlp_params(params2, nl2, mxu_dtype=jnp.float32)
    o2 = jax.block_until_ready(mlp_forward(packed2, x2, force_tiled=True))
    r2 = mlp_forward_ref(params2, x2, nl2)
    assert o2.shape == (n2, out2)
    assert jnp.allclose(o2, r2, atol=2e-2, rtol=2e-2), "tiled path mismatch vs reference"

    # Test 4: num_layers == 1 (pure linear) path.
    params1 = init_mlp_params(jax.random.PRNGKey(1), 1, input_dim, hidden_dim, output_dim)
    packed1 = prepack_mlp_params(params1, 1, mxu_dtype=jnp.float32)
    o1 = jax.block_until_ready(mlp_forward(packed1, x))
    r1 = mlp_forward_ref(params1, x, 1)
    assert jnp.allclose(o1, r1, atol=1e-3, rtol=1e-3), "single-linear path mismatch"

    print("KERNEL_OK")
</pallas_src>

<mosaic_0001>
module attributes {stable_mosaic.version = 11 : i64} {
  func.func @kernel(%arg0: memref<8x128xf32, #tpu.memory_space<vmem>>, %arg1: memref<128x128xf32, #tpu.memory_space<vmem>>, %arg2: memref<1x128xf32, #tpu.memory_space<vmem>>, %arg3: memref<1x128xf32, #tpu.memory_space<vmem>>, %arg4: memref<128x128xf32, #tpu.memory_space<vmem>>, %arg5: memref<1x128xf32, #tpu.memory_space<vmem>>, %arg6: memref<1x128xf32, #tpu.memory_space<vmem>>, %arg7: memref<128x128xf32, #tpu.memory_space<vmem>>, %arg8: memref<1x128xf32, #tpu.memory_space<vmem>>, %arg9: memref<8x128xf32, #tpu.memory_space<vmem>>) attributes {dimension_semantics = [], scalar_prefetch = 0 : i64, scratch_operands = 0 : i64, tpu.core_type = #tpu.core_type<tc>} {
    %c0 = arith.constant 0 : index
    %c0_0 = arith.constant 0 : index
    %0 = vector.load %arg0[%c0, %c0_0] : memref<8x128xf32, #tpu.memory_space<vmem>>, vector<8x128xf32>
    %c0_1 = arith.constant 0 : index
    %c0_2 = arith.constant 0 : index
    %1 = vector.load %arg1[%c0_1, %c0_2] : memref<128x128xf32, #tpu.memory_space<vmem>>, vector<128x128xf32>
    %cst = arith.constant dense<0.000000e+00> : vector<8x128xf32>
    %2 = tpu.matmul %0, %1, %cst {dimension_numbers = #tpu.dot_dimension_numbers<[1], [0], [0], [1], [0, 0, 1, 1], [], []>} : vector<8x128xf32>, vector<128x128xf32>, vector<8x128xf32> -> vector<8x128xf32>
    %cst_3 = arith.constant dense<0.000000e+00> : vector<128xf32>
    %3 = vector.multi_reduction <add>, %2, %cst_3 [0] : vector<8x128xf32> to vector<128xf32>
    %4 = vector.shape_cast %3 : vector<128xf32> to vector<1x128xf32>
    %cst_4 = arith.constant 1.250000e-01 : f32
    %5 = vector.broadcast %cst_4 : f32 to vector<1x128xf32>
    %6 = arith.mulf %4, %5 : vector<1x128xf32>
    %7 = vector.broadcast %6 : vector<1x128xf32> to vector<8x128xf32>
    %8 = arith.subf %2, %7 : vector<8x128xf32>
    %9 = arith.mulf %8, %8 : vector<8x128xf32>
    %cst_5 = arith.constant dense<0.000000e+00> : vector<128xf32>
    %10 = vector.multi_reduction <add>, %9, %cst_5 [0] : vector<8x128xf32> to vector<128xf32>
    %11 = vector.shape_cast %10 : vector<128xf32> to vector<1x128xf32>
    %cst_6 = arith.constant 1.250000e-01 : f32
    %12 = vector.broadcast %cst_6 : f32 to vector<1x128xf32>
    %13 = arith.mulf %11, %12 : vector<1x128xf32>
    %cst_7 = arith.constant 9.99999974E-6 : f32
    %14 = vector.broadcast %cst_7 : f32 to vector<1x128xf32>
    %15 = arith.addf %13, %14 : vector<1x128xf32>
    %16 = math.rsqrt %15 : vector<1x128xf32>
    %17 = vector.broadcast %16 : vector<1x128xf32> to vector<8x128xf32>
    %18 = arith.mulf %8, %17 : vector<8x128xf32>
    %c0_8 = arith.constant 0 : index
    %c0_9 = arith.constant 0 : index
    %19 = vector.load %arg2[%c0_8, %c0_9] : memref<1x128xf32, #tpu.memory_space<vmem>>, vector<1x128xf32>
    %20 = vector.broadcast %19 : vector<1x128xf32> to vector<8x128xf32>
    %21 = arith.mulf %18, %20 : vector<8x128xf32>
    %c0_10 = arith.constant 0 : index
    %c0_11 = arith.constant 0 : index
    %22 = vector.load %arg3[%c0_10, %c0_11] : memref<1x128xf32, #tpu.memory_space<vmem>>, vector<1x128xf32>
    %23 = vector.broadcast %22 : vector<1x128xf32> to vector<8x128xf32>
    %24 = arith.addf %21, %23 : vector<8x128xf32>
    %cst_12 = arith.constant 0.000000e+00 : f32
    %25 = vector.broadcast %cst_12 : f32 to vector<8x128xf32>
    %26 = arith.maximumf %24, %25 : vector<8x128xf32>
    %c0_13 = arith.constant 0 : index
    %c0_14 = arith.constant 0 : index
    %27 = vector.load %arg4[%c0_13, %c0_14] : memref<128x128xf32, #tpu.memory_space<vmem>>, vector<128x128xf32>
    %cst_15 = arith.constant dense<0.000000e+00> : vector<8x128xf32>
    %28 = tpu.matmul %26, %27, %cst_15 {dimension_numbers = #tpu.dot_dimension_numbers<[1], [0], [0], [1], [0, 0, 1, 1], [], []>} : vector<8x128xf32>, vector<128x128xf32>, vector<8x128xf32> -> vector<8x128xf32>
    %cst_16 = arith.constant dense<0.000000e+00> : vector<128xf32>
    %29 = vector.multi_reduction <add>, %28, %cst_16 [0] : vector<8x128xf32> to vector<128xf32>
    %30 = vector.shape_cast %29 : vector<128xf32> to vector<1x128xf32>
    %cst_17 = arith.constant 1.250000e-01 : f32
    %31 = vector.broadcast %cst_17 : f32 to vector<1x128xf32>
    %32 = arith.mulf %30, %31 : vector<1x128xf32>
    %33 = vector.broadcast %32 : vector<1x128xf32> to vector<8x128xf32>
    %34 = arith.subf %28, %33 : vector<8x128xf32>
    %35 = arith.mulf %34, %34 : vector<8x128xf32>
    %cst_18 = arith.constant dense<0.000000e+00> : vector<128xf32>
    %36 = vector.multi_reduction <add>, %35, %cst_18 [0] : vector<8x128xf32> to vector<128xf32>
    %37 = vector.shape_cast %36 : vector<128xf32> to vector<1x128xf32>
    %cst_19 = arith.constant 1.250000e-01 : f32
    %38 = vector.broadcast %cst_19 : f32 to vector<1x128xf32>
    %39 = arith.mulf %37, %38 : vector<1x128xf32>
    %cst_20 = arith.constant 9.99999974E-6 : f32
    %40 = vector.broadcast %cst_20 : f32 to vector<1x128xf32>
    %41 = arith.addf %39, %40 : vector<1x128xf32>
    %42 = math.rsqrt %41 : vector<1x128xf32>
    %43 = vector.broadcast %42 : vector<1x128xf32> to vector<8x128xf32>
    %44 = arith.mulf %34, %43 : vector<8x128xf32>
    %c0_21 = arith.constant 0 : index
    %c0_22 = arith.constant 0 : index
    %45 = vector.load %arg5[%c0_21, %c0_22] : memref<1x128xf32, #tpu.memory_space<vmem>>, vector<1x128xf32>
    %46 = vector.broadcast %45 : vector<1x128xf32> to vector<8x128xf32>
    %47 = arith.mulf %44, %46 : vector<8x128xf32>
    %c0_23 = arith.constant 0 : index
    %c0_24 = arith.constant 0 : index
    %48 = vector.load %arg6[%c0_23, %c0_24] : memref<1x128xf32, #tpu.memory_space<vmem>>, vector<1x128xf32>
    %49 = vector.broadcast %48 : vector<1x128xf32> to vector<8x128xf32>
    %50 = arith.addf %47, %49 : vector<8x128xf32>
    %cst_25 = arith.constant 0.000000e+00 : f32
    %51 = vector.broadcast %cst_25 : f32 to vector<8x128xf32>
    %52 = arith.maximumf %50, %51 : vector<8x128xf32>
    %c0_26 = arith.constant 0 : index
    %c0_27 = arith.constant 0 : index
    %53 = vector.load %arg7[%c0_26, %c0_27] : memref<128x128xf32, #tpu.memory_space<vmem>>, vector<128x128xf32>
    %cst_28 = arith.constant dense<0.000000e+00> : vector<8x128xf32>
    %54 = tpu.matmul %52, %53, %cst_28 {dimension_numbers = #tpu.dot_dimension_numbers<[1], [0], [0], [1], [0, 0, 1, 1], [], []>} : vector<8x128xf32>, vector<128x128xf32>, vector<8x128xf32> -> vector<8x128xf32>
    %c0_29 = arith.constant 0 : index
    %c0_30 = arith.constant 0 : index
    %55 = vector.load %arg8[%c0_29, %c0_30] : memref<1x128xf32, #tpu.memory_space<vmem>>, vector<1x128xf32>
    %56 = vector.broadcast %55 : vector<1x128xf32> to vector<8x128xf32>
    %57 = arith.addf %54, %56 : vector<8x128xf32>
    %c0_31 = arith.constant 0 : index
    %c0_32 = arith.constant 0 : index
    %58 = vector.load %arg9[%c0_31, %c0_32] : memref<8x128xf32, #tpu.memory_space<vmem>>, vector<8x128xf32>
    tpu.vector_store %arg9[%c0_31, %c0_32], %57 {strides = array<i32>} : memref<8x128xf32, #tpu.memory_space<vmem>>, vector<8x128xf32>,
    return
  }
}

</mosaic_0001>

<bundles_post_ra>
// kernel: tpu_custom_call.1
= control target key start
LH: loop header
LB: loop body
LE: loop exit
PB: predicated region body
PF: predicated region fallthrough
CT: control target
= control target key end

     0   :  { %14 = vsyncpa [#allocation3], 0  ;;  %s876_s0 = inlined_call_operand.hbm [shape: f32[8,128], index: 0, kind: input, shape index: {}]   ;;  %s877_s1 = inlined_call_operand.hbm [shape: f32[128,128], index: 1, kind: input, shape index: {}]   ;;  %s878_s2 = inlined_call_operand.vmem [shape: f32[1,128], index: 2, kind: input, shape index: {}]   ;;  %s879_s3 = inlined_call_operand.vmem [shape: f32[1,128], index: 3, kind: input, shape index: {}]   ;;  %s880_s4 = inlined_call_operand.hbm [shape: f32[128,128], index: 4, kind: input, shape index: {}]   ;;  %s881_s5 = inlined_call_operand.vmem [shape: f32[1,128], index: 5, kind: input, shape index: {}]   ;;  %s882_s6 = inlined_call_operand.vmem [shape: f32[1,128], index: 6, kind: input, shape index: {}]   ;;  %s883_s7 = inlined_call_operand.hbm [shape: f32[128,128], index: 7, kind: input, shape index: {}]   ;;  %s884_s8 = inlined_call_operand.vmem [shape: f32[1,128], index: 8, kind: input, shape index: {}]   ;;  %s885_s9 = inlined_call_operand.hbm [shape: f32[8,128], index: 9, kind: output, shape index: {}]  }
   0x1   :  { %15 = vsyncpa [#allocation6], 0 }
   0x2   :  { %16 = vsyncpa [#allocation9], 0 }
   0x3   :  { %17 = vsyncpa [#allocation4], 0  ;;  %s724_s30 = smov [#allocation5]  }
   0x4   :  { %s33_s10 = sshll.u32 %s724_s30, 4  ;;  %s34_s10 = int_to_ptr.vmem [resolvable:$true] %s33_s10 }
   0x5   :  { %s624_s11 = scalar_lea.vmem %s34_s10, 2048  ;;  %p629_p1 = scmp.lt.s32.totalorder %s34_s10, %s34_s10 }
   0x6   :  { %p625_p0 = scmp.ne.s32.totalorder %s34_s10, %s624_s11  ;;  %p630_p2 = scmp.lt.s32.totalorder %s624_s11, %s624_s11 }
   0x8   :  { %p631_p3 = por %p630_p2, %p629_p1 }
   0xa   :  { %p632_p4 = pnand %p631_p3, %p625_p0 }
   0xc   :  { %635 = shalt.err (!%p632_p4)
}
   0xd   :  { %s725_s12 = smov 128   ;;  %s726_s13 = smov 8  }
   0xe   :  { %39 = dma.hbm_to_vmem [thread:$0]  %s877_s1, 2048, %s34_s10, [#allocation6], %s725_s12, %s725_s12, %s726_s13  }
   0xf   :  { %s727_s16 = smov [#allocation2]   ;;  %s728_s18 = smov [#allocation7]  }
  0x10   :  { %s24_s17 = sshll.u32 %s727_s16, 4  ;;  %s49_s19 = sshll.u32 %s728_s18, 4  ;;  %s25_s17 = int_to_ptr.vmem [resolvable:$true] %s24_s17  ;;  %s50_s19 = int_to_ptr.vmem [resolvable:$true] %s49_s19 }
  0x11   :  { %s644_s20 = scalar_lea.vmem %s25_s17, 128  ;;  %p649_p6 = scmp.lt.s32.totalorder %s25_s17, %s25_s17 }
  0x12   :  { %p645_p5 = scmp.ne.s32.totalorder %s25_s17, %s644_s20  ;;  %p650_p7 = scmp.lt.s32.totalorder %s644_s20, %s644_s20 }
  0x14   :  { %p651_p8 = por %p650_p7, %p649_p6 }
  0x16   :  { %p652_p9 = pnand %p651_p8, %p645_p5 }
  0x18   :  { %655 = shalt.err (!%p652_p9)
}
  0x19   :  { %27 = dma.hbm_to_vmem [thread:$0]  %s876_s0, 128, %s25_s17, [#allocation3]  }
  0x1a   :  { %s664_s23 = scalar_lea.vmem %s50_s19, 2048  ;;  %p669_p11 = scmp.lt.s32.totalorder %s50_s19, %s50_s19 }
  0x1b   :  { %p665_p10 = scmp.ne.s32.totalorder %s50_s19, %s664_s23  ;;  %p670_p12 = scmp.lt.s32.totalorder %s664_s23, %s664_s23 }
  0x1d   :  { %p671_p13 = por %p670_p12, %p669_p11 }
  0x1f   :  { %p672_p0 = pnand %p671_p13, %p665_p10 }
  0x21   :  { %675 = shalt.err (!%p672_p0)
}
  0x22   :  { %55 = dma.hbm_to_vmem [thread:$0]  %s880_s4, 2048, %s50_s19, [#allocation6], %s725_s12, %s725_s12, %s726_s13  }
  0x23   :  { %s729_s25 = smov [#allocation8]  }
  0x24   :  { %s65_s26 = sshll.u32 %s729_s25, 4  ;;  %s66_s26 = int_to_ptr.vmem [resolvable:$true] %s65_s26 }
  0x25   :  { %s684_s27 = scalar_lea.vmem %s66_s26, 2048  ;;  %p689_p2 = scmp.lt.s32.totalorder %s66_s26, %s66_s26 }
  0x26   :  { %p685_p1 = scmp.ne.s32.totalorder %s66_s26, %s684_s27  ;;  %p690_p3 = scmp.lt.s32.totalorder %s684_s27, %s684_s27 }
  0x28   :  { %p691_p4 = por %p690_p3, %p689_p2 }
  0x2a   :  { %p692_p5 = pnand %p691_p4, %p685_p1 }
  0x2c   :  { %695 = shalt.err (!%p692_p5)
}
  0x2d   :  { %71 = dma.hbm_to_vmem [thread:$0]  %s883_s7, 2048, %s66_s26, [#allocation9], %s725_s12, %s725_s12, %s726_s13  }
  0x2e   :  { %716 = dma.done.wait [#allocation3], 128  }
  0x2f   :  { %717 = vsyncadd [#allocation3], 4294967168 }
  0x30   :  { %718 = dma.done.wait [#allocation6], 4096  }
  0x31   :  { %719 = vsyncadd [#allocation6], 4294963200 }
  0x32   :  { %720 = dma.done.wait [#allocation9], 2048  }
  0x33   :  { %721 = vsyncadd [#allocation9], 4294965248  ;;  %v730_v0 = vmov 0.0   ;;  %vm731_vm0 = vmmov 0   ;;  %v102_v1 = vld [vmem:[#allocation5 + $0x78] sm:$0xff]  ;;  %v101_v2 = vld [vmem:[#allocation5 + $0x70] sm:$0xff] }
  0x34   :  { %498 = vmatprep.subr.mxu0 %v730_v0  ;;  %530 = vmatprep.mubr.msk.f32.mxu0 %vm731_vm0, %v730_v0  ;;  %v100_v3 = vld [vmem:[#allocation5 + $0x68] sm:$0xff]  ;;  %v99_v4 = vld [vmem:[#allocation5 + $0x60] sm:$0xff]  ;;  %v98_v5 = vld [vmem:[#allocation5 + $0x58] sm:$0xff]  ;;  %s732_s14 = smov [#allocation10]  }
  0x35   :  { %533 = vmatprep.subr.mxu1 %v730_v0  ;;  %565 = vmatprep.mubr.msk.f32.mxu1 %vm731_vm0, %v730_v0  ;;  %v97_v6 = vld [vmem:[#allocation5 + $0x50] sm:$0xff]  ;;  %v96_v7 = vld [vmem:[#allocation5 + $0x48] sm:$0xff]  ;;  %v95_v8 = vld [vmem:[#allocation5 + $0x40] sm:$0xff]  ;;  %s431_s15 = sshll.u32 %s732_s14, 4  ;;  %s432_s15 = int_to_ptr.vmem [resolvable:$true] %s431_s15 }
  0x36   :  { %499 = vmatpush3.msra.mxu0 %v102_v1  ;;  %v94_v9 = vld [vmem:[#allocation5 + $0x38] sm:$0xff]  ;;  %v93_v10 = vld [vmem:[#allocation5 + $0x30] sm:$0xff]  ;;  %v92_v11 = vld [vmem:[#allocation5 + $0x28] sm:$0xff]  ;;  %p701_p7 = scmp.lt.s32.totalorder %s432_s15, %s432_s15 }
  0x37   :  { %500 = vmatprep.subr.mxu0 %v730_v0  ;;  %v91_v12 = vld [vmem:[#allocation5 + $0x20] sm:$0xff]  ;;  %v90_v13 = vld [vmem:[#allocation5 + $0x18] sm:$0xff]  ;;  %v89_v14 = vld [vmem:[#allocation5 + $0x10] sm:$0xff] }
  0x38   :  { %501 = vmatpush3.msra.mxu0 %v101_v2  ;;  %v88_v15 = vld [vmem:[#allocation5 + $0x8] sm:$0xff]  ;;  %v87_v16 = vld [vmem:[#allocation5] sm:$0xff]  ;;  %v86_v17 = vld [vmem:[#allocation2] sm:$0xff] }
  0x39   :  { %502 = vmatprep.subr.mxu0 %v730_v0  ;;  %v224_v18 = vld [vmem:[#allocation7 + $0x78] sm:$0xff]  ;;  %v223_v19 = vld [vmem:[#allocation7 + $0x70] sm:$0xff]  ;;  %v222_v20 = vld [vmem:[#allocation7 + $0x68] sm:$0xff] }
  0x3a   :  { %503 = vmatpush3.msra.mxu0 %v100_v3  ;;  %534 = vmatpush3.msra.mxu1 %v224_v18  ;;  %v221_v21 = vld [vmem:[#allocation7 + $0x60] sm:$0xff]  ;;  %v220_v22 = vld [vmem:[#allocation7 + $0x58] sm:$0xff]  ;;  %v219_v23 = vld [vmem:[#allocation7 + $0x50] sm:$0xff] }
  0x3b   :  { %504 = vmatprep.subr.mxu0 %v730_v0  ;;  %535 = vmatprep.subr.mxu1 %v730_v0  ;;  %v218_v24 = vld [vmem:[#allocation7 + $0x48] sm:$0xff]  ;;  %v217_v25 = vld [vmem:[#allocation7 + $0x40] sm:$0xff]  ;;  %v216_v26 = vld [vmem:[#allocation7 + $0x38] sm:$0xff] }
  0x3c   :  { %505 = vmatpush3.msra.mxu0 %v99_v4  ;;  %536 = vmatpush3.msra.mxu1 %v223_v19  ;;  %v215_v27 = vld [vmem:[#allocation7 + $0x30] sm:$0xff]  ;;  %v214_v28 = vld [vmem:[#allocation7 + $0x28] sm:$0xff]  ;;  %v213_v29 = vld [vmem:[#allocation7 + $0x20] sm:$0xff] }
  0x3d   :  { %506 = vmatprep.subr.mxu0 %v730_v0  ;;  %537 = vmatprep.subr.mxu1 %v730_v0  ;;  %v212_v30 = vld [vmem:[#allocation7 + $0x18] sm:$0xff]  ;;  %v211_v31 = vld [vmem:[#allocation7 + $0x10] sm:$0xff]  ;;  %v210_v32 = vld [vmem:[#allocation7 + $0x8] sm:$0xff] }
  0x3e   :  { %507 = vmatpush3.msra.mxu0 %v98_v5  ;;  %538 = vmatpush3.msra.mxu1 %v222_v20  ;;  %v209_v33 = vld [vmem:[#allocation7] sm:$0xff]  ;;  %v442_v54 = vld [vmem:[%s878_s2] ss:$0 sm:$0xff]  ;;  %v345_v61 = vld [vmem:[#allocation8 + $0x70] sm:$0xff] }
  0x3f   :  { %508 = vmatprep.subr.mxu0 %v730_v0  ;;  %539 = vmatprep.subr.mxu1 %v730_v0  ;;  %v443_v56 = vld [vmem:[%s879_s3] ss:$0 sm:$0xff]  ;;  %v344_v62 = vld [vmem:[#allocation8 + $0x68] sm:$0xff]  ;;  %v343_v63 = vld [vmem:[#allocation8 + $0x60] sm:$0xff] }
  0x40   :  { %509 = vmatpush3.msra.mxu0 %v97_v6  ;;  %540 = vmatpush3.msra.mxu1 %v221_v21  ;;  %v346_v60 = vld [vmem:[#allocation8 + $0x78] sm:$0xff]  ;;  %v341_v2 = vld [vmem:[#allocation8 + $0x50] sm:$0xff]  ;;  %v340_v3 = vld [vmem:[#allocation8 + $0x48] sm:$0xff] }
  0x41   :  { %510 = vmatprep.subr.mxu0 %v730_v0  ;;  %541 = vmatprep.subr.mxu1 %v730_v0  ;;  %v342_v1 = vld [vmem:[#allocation8 + $0x58] sm:$0xff]  ;;  %v339_v4 = vld [vmem:[#allocation8 + $0x40] sm:$0xff]  ;;  %v337_v6 = vld [vmem:[#allocation8 + $0x30] sm:$0xff] }
  0x42   :  { %511 = vmatpush3.msra.mxu0 %v96_v7  ;;  %542 = vmatpush3.msra.mxu1 %v220_v22  ;;  %v338_v5 = vld [vmem:[#allocation8 + $0x38] sm:$0xff]  ;;  %v336_v7 = vld [vmem:[#allocation8 + $0x28] sm:$0xff] }
  0x43   :  { %512 = vmatprep.subr.mxu0 %v730_v0  ;;  %543 = vmatprep.subr.mxu1 %v730_v0 }
  0x44   :  { %513 = vmatpush3.msra.mxu0 %v95_v8  ;;  %544 = vmatpush3.msra.mxu1 %v219_v23  ;;  %v335_v8 = vld [vmem:[#allocation8 + $0x20] sm:$0xff] }
  0x45   :  { %514 = vmatprep.subr.mxu0 %v730_v0  ;;  %545 = vmatprep.subr.mxu1 %v730_v0 }
  0x46   :  { %515 = vmatpush3.msra.mxu0 %v94_v9  ;;  %546 = vmatpush3.msra.mxu1 %v218_v24  ;;  %v334_v9 = vld [vmem:[#allocation8 + $0x18] sm:$0xff] }
  0x47   :  { %516 = vmatprep.subr.mxu0 %v730_v0  ;;  %547 = vmatprep.subr.mxu1 %v730_v0 }
  0x48   :  { %517 = vmatpush3.msra.mxu0 %v93_v10  ;;  %548 = vmatpush3.msra.mxu1 %v217_v25  ;;  %v333_v10 = vld [vmem:[#allocation8 + $0x10] sm:$0xff] }
  0x49   :  { %518 = vmatprep.subr.mxu0 %v730_v0  ;;  %549 = vmatprep.subr.mxu1 %v730_v0 }
  0x4a   :  { %519 = vmatpush3.msra.mxu0 %v92_v11  ;;  %550 = vmatpush3.msra.mxu1 %v216_v26  ;;  %v332_v11 = vld [vmem:[#allocation8 + $0x8] sm:$0xff] }
  0x4b   :  { %520 = vmatprep.subr.mxu0 %v730_v0  ;;  %551 = vmatprep.subr.mxu1 %v730_v0 }
  0x4c   :  { %521 = vmatpush3.msra.mxu0 %v91_v12  ;;  %552 = vmatpush3.msra.mxu1 %v215_v27  ;;  %v331_v12 = vld [vmem:[#allocation8] sm:$0xff] }
  0x4d   :  { %522 = vmatprep.subr.mxu0 %v730_v0  ;;  %553 = vmatprep.subr.mxu1 %v730_v0 }
  0x4e   :  { %523 = vmatpush3.msra.mxu0 %v90_v13  ;;  %554 = vmatpush3.msra.mxu1 %v214_v28 }
  0x4f   :  { %524 = vmatprep.subr.mxu0 %v730_v0  ;;  %555 = vmatprep.subr.mxu1 %v730_v0 }
  0x50   :  { %525 = vmatpush3.msra.mxu0 %v89_v14  ;;  %556 = vmatpush3.msra.mxu1 %v213_v29 }
  0x51   :  { %526 = vmatprep.subr.mxu0 %v730_v0  ;;  %557 = vmatprep.subr.mxu1 %v730_v0 }
  0x52   :  { %527 = vmatpush3.msra.mxu0 %v88_v15  ;;  %558 = vmatpush3.msra.mxu1 %v212_v30 }
  0x53   :  { %528 = vmatprep.subr.mxu0 %v730_v0  ;;  %559 = vmatprep.subr.mxu1 %v730_v0 }
  0x54   :  { %529 = vmatpush3.msra.mxu0 %v87_v16  ;;  %560 = vmatpush3.msra.mxu1 %v211_v31 }
  0x55   :  { %531 = vmatmul.mubr.f32.vlgmr.msra.gmra.mxu0 %v86_v17  ;;  %568 = vmatprep.subr.mxu0 %v730_v0 }
  0x56   :  { %600 = vmatprep.mubr.msk.f32.mxu0 %vm731_vm0, %v730_v0  ;;  %561 = vmatprep.subr.mxu1 %v730_v0 }
  0x57   :  { %562 = vmatpush3.msra.mxu1 %v210_v32  ;;  %569 = vmatpush3.msra.mxu0 %v346_v60  ;;  %v444_v32 = vld [vmem:[%s881_s5] ss:$0 sm:$0xff]  ;;  %s696_s5 = scalar_lea.vmem %s432_s15, 128 }
  0x58   :  { %563 = vmatprep.subr.mxu1 %v730_v0  ;;  %570 = vmatprep.subr.mxu0 %v730_v0  ;;  %p697_p6 = scmp.ne.s32.totalorder %s432_s15, %s696_s5  ;;  %p702_p8 = scmp.lt.s32.totalorder %s696_s5, %s696_s5 }
  0x59   :  { %564 = vmatpush3.msra.mxu1 %v209_v33  ;;  %571 = vmatpush3.msra.mxu0 %v345_v61 }
  0x5a   :  { %572 = vmatprep.subr.mxu0 %v730_v0  ;;  %p703_p9 = por %p702_p8, %p701_p7 }
  0x5b   :  { %573 = vmatpush3.msra.mxu0 %v344_v62 }
  0x5c   :  { %574 = vmatprep.subr.mxu0 %v730_v0  ;;  %p704_p10 = pnand %p703_p9, %p697_p6 }
  0x5d   :  { %575 = vmatpush3.msra.mxu0 %v343_v63 }
  0x5e   :  { %576 = vmatprep.subr.mxu0 %v730_v0 }
  0x5f   :  { %577 = vmatpush3.msra.mxu0 %v342_v1 }
  0x60   :  { %578 = vmatprep.subr.mxu0 %v730_v0 }
  0x61   :  { %579 = vmatpush3.msra.mxu0 %v341_v2 }
  0x62   :  { %580 = vmatprep.subr.mxu0 %v730_v0 }
  0x63   :  { %581 = vmatpush3.msra.mxu0 %v340_v3 }
  0x64   :  { %582 = vmatprep.subr.mxu0 %v730_v0 }
  0x65   :  { %583 = vmatpush3.msra.mxu0 %v339_v4 }
  0x66   :  { %584 = vmatprep.subr.mxu0 %v730_v0 }
  0x67   :  { %585 = vmatpush3.msra.mxu0 %v338_v5 }
  0x68   :  { %586 = vmatprep.subr.mxu0 %v730_v0 }
  0x69   :  { %587 = vmatpush3.msra.mxu0 %v337_v6 }
  0x6a   :  { %588 = vmatprep.subr.mxu0 %v730_v0 }
  0x6b   :  { %589 = vmatpush3.msra.mxu0 %v336_v7 }
  0x6c   :  { %590 = vmatprep.subr.mxu0 %v730_v0 }
  0x6d   :  { %591 = vmatpush3.msra.mxu0 %v335_v8 }
  0x6e   :  { %592 = vmatprep.subr.mxu0 %v730_v0 }
  0x6f   :  { %593 = vmatpush3.msra.mxu0 %v334_v9 }
  0x70   :  { %594 = vmatprep.subr.mxu0 %v730_v0 }
  0x71   :  { %595 = vmatpush3.msra.mxu0 %v333_v10 }
  0x72   :  { %596 = vmatprep.subr.mxu0 %v730_v0 }
  0x73   :  { %597 = vmatpush3.msra.mxu0 %v332_v11 }
  0x74   :  { %598 = vmatprep.subr.mxu0 %v730_v0 }
  0x75   :  { %599 = vmatpush3.msra.mxu0 %v331_v12 }
 0x115   :  { %v169_v34 = vpop.f32.mrf.mxu0 }
 0x116   :  { %v173_v35 = vrot.slane %v169_v34, 4 }
 0x117   :  { %v532_v36 = vpop.f32.mrf.mxu0 }
 0x118   :  { %v174_v37 = vadd.f32 %v173_v35, %v169_v34 }
 0x11a   :  { %v175_v38 = vrot.slane %v174_v37, 2 }
 0x11c   :  { %v176_v39 = vadd.f32 %v175_v38, %v174_v37  ;;  %v446_v38 = vld [vmem:[%s884_s8] ss:$0 sm:$0xff] }
 0x11e   :  { %v177_v40 = vrot.slane %v176_v39, 1 }
 0x120   :  { %v178_v41 = vadd.f32 %v177_v40, %v176_v39 }
 0x122   :  { %v179_v42 = vmul.f32 0.125, %v178_v41 }
 0x124   :  { %v180_v43 = vsub.f32 %v169_v34, %v179_v42  ;;  %v445_v34 = vld [vmem:[%s882_s6] ss:$0 sm:$0xff] }
 0x126   :  { %v181_v44 = vmul.f32 %v180_v43, %v180_v43 }
 0x128   :  { %v182_v45 = vrot.slane %v181_v44, 4 }
 0x12a   :  { %v183_v46 = vadd.f32 %v182_v45, %v181_v44 }
 0x12c   :  { %v184_v47 = vrot.slane %v183_v46, 2 }
 0x12e   :  { %v185_v48 = vadd.f32 %v184_v47, %v183_v46 }
 0x130   :  { %v186_v49 = vrot.slane %v185_v48, 1 }
 0x132   :  { %v187_v50 = vadd.f32 %v186_v49, %v185_v48 }
 0x134   :  { %v188_v51 = vmul.f32 0.125, %v187_v50 }
 0x136   :  { %v189_v52 = vadd.f32 1e-05, %v188_v51 }
 0x138   :  { %612 = vrsqrt.f32 %v189_v52 }
 0x145   :  { %v613_v53 = vpop.eup %612 }
 0x146   :  { %v191_v55 = vmul.f32 %v613_v53, %v180_v43 }
 0x148   :  { %v199_v57 = vmul.f32 %v442_v54, %v191_v55 }
 0x14a   :  { %v207_v58 = vadd.f32 %v443_v56, %v199_v57 }
 0x14c   :  { %v208_v59 = vmax.f32 %v207_v58, 0.0 }
 0x14e   :  { %566 = vmatmul.mubr.f32.vlgmr.msra.gmra.mxu1 %v208_v59 }
 0x20e   :  { %v291_v13 = vpop.f32.mrf.mxu1 }
 0x20f   :  { %v295_v14 = vrot.slane %v291_v13, 4 }
 0x210   :  { %v567_v15 = vpop.f32.mrf.mxu1 }
 0x211   :  { %v296_v16 = vadd.f32 %v295_v14, %v291_v13 }
 0x213   :  { %v297_v17 = vrot.slane %v296_v16, 2 }
 0x215   :  { %v298_v18 = vadd.f32 %v297_v17, %v296_v16 }
 0x217   :  { %v299_v19 = vrot.slane %v298_v18, 1 }
 0x219   :  { %v300_v20 = vadd.f32 %v299_v19, %v298_v18 }
 0x21b   :  { %v301_v21 = vmul.f32 0.125, %v300_v20 }
 0x21d   :  { %v302_v22 = vsub.f32 %v291_v13, %v301_v21 }
 0x21f   :  { %v303_v23 = vmul.f32 %v302_v22, %v302_v22 }
 0x221   :  { %v304_v24 = vrot.slane %v303_v23, 4 }
 0x223   :  { %v305_v25 = vadd.f32 %v304_v24, %v303_v23 }
 0x225   :  { %v306_v26 = vrot.slane %v305_v25, 2 }
 0x227   :  { %v307_v27 = vadd.f32 %v306_v26, %v305_v25 }
 0x229   :  { %v308_v28 = vrot.slane %v307_v27, 1 }
 0x22b   :  { %v309_v29 = vadd.f32 %v308_v28, %v307_v27 }
 0x22d   :  { %v310_v30 = vmul.f32 0.125, %v309_v29 }
 0x22f   :  { %v311_v0 = vadd.f32 1e-05, %v310_v30 }
 0x231   :  { %614 = vrsqrt.f32 %v311_v0 }
 0x23e   :  { %v615_v31 = vpop.eup %614 }
 0x23f   :  { %v313_v33 = vmul.f32 %v615_v31, %v302_v22 }
 0x241   :  { %v321_v35 = vmul.f32 %v444_v32, %v313_v33 }
 0x243   :  { %v329_v36 = vadd.f32 %v445_v34, %v321_v35 }
 0x245   :  { %v330_v37 = vmax.f32 %v329_v36, 0.0 }
 0x247   :  { %601 = vmatmul.mubr.f32.vlgmr.msra.gmra.mxu0 %v330_v37 }
 0x307   :  { %v420_v39 = vpop.f32.mrf.mxu0 }
 0x308   :  { %v421_v40 = vadd.f32 %v446_v38, %v420_v39 }
 0x309   :  { %v602_v41 = vpop.f32.mrf.mxu0 }
 0x30a   :  { %424 = vst [vmem:[#allocation10] sm:$0xff] %v421_v40 }
 0x30b   :  { %707 = shalt.err (!%p704_p10)
}
 0x30c   :  { %434 = dma.vmem_to_hbm [thread:$0]  %s432_s15, 128, %s885_s9, [#allocation4]  }
 0x30d   :  { %722 = dma.done.wait [#allocation4], 128  }
 0x30e   :  { %723 = vsyncadd [#allocation4], 4294967168 }
 0x30f   :  { %438 = vsyncpa [#allocation3], 1 }
 0x310   :  { %439 = vsyncpa [#allocation6], 1 }
 0x311   :  { %440 = vsyncpa [#allocation9], 1 }
 0x312   :  { %441 = vsyncpa [#allocation4], 1 }

</bundles_post_ra>
